<compile_context>
chip_gen: v5e
topology: v5e:2x2
jax: 0.10.0
libtpu: 0.0.40
codegen_flags: <defaults>
</compile_context>

<pallas_src>
import functools

import jax
import jax.numpy as jnp
from jax import lax
from jax.experimental import pallas as pl
from jax.experimental.pallas import tpu as pltpu


def _coordconv_kernel(x_ref, w_ref, o_ref, *, H, W, KH, KW, pad_h, pad_w,
                      Cin, C_aug, with_r, compute_dtype):
    # x_ref: (Bt, C_pad, H*W)     raw input, channels zero-padded to C_pad,
    #                             spatial dims flattened on the lane axis
    # w_ref: (Cout, KH*KW*C_pad)  im2col weight, bias folded into center tap
    # o_ref: (Bt, Cout, H*W)      lane-dense output
    Bt, C_pad, HW = x_ref.shape

    # ---- pixel indices (row i, col j) from the flat lane index ----
    q = lax.broadcasted_iota(jnp.int32, (1, HW), 1)
    if W & (W - 1) == 0:                      # power-of-two W: exact int math
        i_idx = q >> (W.bit_length() - 1)
        j_idx = q & (W - 1)
    else:
        # exact for H*W < 2**22 (asserted in the wrapper)
        i_idx = jnp.floor((q.astype(jnp.float32) + 0.5) * (1.0 / W)).astype(jnp.int32)
        j_idx = q - i_idx * W
    i_f = i_idx.astype(jnp.float32)
    j_f = j_idx.astype(jnp.float32)

    # ---- AddCoords rows + folded-bias ones row, overlaid on the zero pad ----
    xx = 2.0 * i_f * (1.0 / max(H - 1, 1)) - 1.0      # varies along H (x_dim)
    yy = 2.0 * j_f * (1.0 / max(W - 1, 1)) - 1.0      # varies along W (y_dim)
    c = lax.broadcasted_iota(jnp.int32, (C_pad, HW), 0)   # channel-row index
    tail = jnp.where(c == Cin, xx, 0.0)
    tail = jnp.where(c == Cin + 1, yy, tail)
    if with_r:
        rr = jnp.sqrt((xx - 0.5) ** 2 + (yy - 0.5) ** 2)
        tail = jnp.where(c == Cin + 2, rr, tail)
    tail = jnp.where(c == C_aug, 1.0, tail)           # ones row -> bias

    # Augmented per-image channel blocks: padded x rows are zero, tail rows
    # are zero where x lives, so a single VPU add composes them exactly.
    imgs = [x_ref[b].astype(jnp.float32) + tail for b in range(Bt)]

    # ---- zero-padding masks, hoisted out of the tap loop (int32 compares) ----
    rmask = {}
    for dh in range(-pad_h, KH - pad_h):
        rmask[dh] = None if dh == 0 else (i_idx >= -dh if dh < 0 else i_idx <= H - 1 - dh)
    cmask = {}
    for dw in range(-pad_w, KW - pad_w):
        cmask[dw] = None if dw == 0 else (j_idx >= -dw if dw < 0 else j_idx <= W - 1 - dw)

    # ---- im2col via lane rotations (XLU) + boundary masks (= zero padding) ----
    tap_blocks = []
    for kh in range(KH):
        for kw in range(KW):
            dh, dw = kh - pad_h, kw - pad_w
            shift = (-(dh * W + dw)) % HW
            m = rmask[dh]
            if cmask[dw] is not None:
                m = cmask[dw] if m is None else (m & cmask[dw])
            pieces = []
            for X_b in imgs:
                p = pltpu.roll(X_b, shift=shift, axis=1) if shift else X_b
                if m is not None:
                    p = jnp.where(m, p, 0.0)
                pieces.append(p)
            # lane-concat images (offsets are multiples of HW >= 128: aligned)
            tap_blocks.append(pieces[0] if Bt == 1 else jnp.concatenate(pieces, axis=1))
    # sublane-concat taps (each block is C_pad rows, a multiple of 8: aligned)
    patches = jnp.concatenate(tap_blocks, axis=0)     # (KH*KW*C_pad, Bt*HW) f32
    patches = patches.astype(compute_dtype)           # bf16 operands by default

    # ---- single fused MXU matmul, f32 accumulation (bias already folded) ----
    acc = jnp.dot(w_ref[...], patches,
                  preferred_element_type=jnp.float32)  # (Cout, Bt*HW)
    for b in range(Bt):                                # lane-aligned slices
        o_ref[b] = acc[:, b * HW:(b + 1) * HW].astype(o_ref.dtype)


def _pick_bt(B, max_bt=8):
    """Images per grid step: pack the batch to amortize the ~0.35us/step grid
    overhead, but keep >= 2 grid steps when B >= 2 so the 'parallel' axis can
    feed both TensorCores on v7x."""
    best = 1
    for cand in range(1, min(B, max_bt) + 1):
        if B % cand:
            continue
        if B // cand >= 2 or B == 1:
            best = cand
    return best


def coord_conv(x, weight, bias, with_r=False, use_bf16=True, bt=None):
    """CoordConv forward: AddCoords + Conv2d(k=3, s=1, p=1, bias=True).

    x:      (B, Cin, H, W)            NCHW (PyTorch convention)
    weight: (Cout, Cin+2[+1], KH, KW) OIHW
    bias:   (Cout,)
    returns (B, Cout, H, W) NCHW
    """
    B, Cin, H, W = x.shape
    Cout, C_w, KH, KW = weight.shape
    C_aug = Cin + 2 + (1 if with_r else 0)
    assert C_w == C_aug, (C_w, C_aug)
    pad_h, pad_w = KH // 2, KW // 2
    HW = H * W
    if W & (W - 1):
        assert HW < (1 << 22), "general-W path uses f32 index reconstruction"

    # +1 channel for the folded-bias ones row, then sublane-align to 8.
    C_pad = ((C_aug + 1 + 7) // 8) * 8
    K_tot = KH * KW * C_pad
    compute_dtype = jnp.bfloat16 if use_bf16 else x.dtype

    # Weight: OIHW -> (Cout, KH*KW*C_pad), tap-major, channel-minor, with the
    # bias as the ones-channel column of the CENTER tap only.
    w_full = jnp.zeros((Cout, KH, KW, C_pad), jnp.float32)
    w_full = w_full.at[..., :C_aug].set(
        jnp.transpose(weight, (0, 2, 3, 1)).astype(jnp.float32))
    w_full = w_full.at[:, pad_h, pad_w, C_aug].set(bias.astype(jnp.float32))
    w2 = w_full.reshape(Cout, K_tot).astype(compute_dtype)

    # Input: NCHW -> (B, C_pad, HW); the channel zero-pad lets the kernel
    # overlay coord rows with a plain add (no sublane-unaligned concat).
    x_pad = jnp.pad(x.reshape(B, Cin, HW), ((0, 0), (0, C_pad - Cin), (0, 0)))

    if bt is None:
        bt = _pick_bt(B)
    assert B % bt == 0, (B, bt)
    grid = (B // bt,)

    # Explicit scoped-VMEM budget with ~2x headroom for double-buffering.
    cbytes = 2 if use_bf16 else 4
    itemsize = x.dtype.itemsize
    est = (2 * bt * C_pad * HW * itemsize          # input block (double-buffered)
           + 2 * bt * Cout * HW * itemsize         # output block (double-buffered)
           + 2 * Cout * K_tot * cbytes             # weight
           + bt * K_tot * HW * (4 + cbytes)        # f32 patches + cast copy
           + 6 * bt * C_pad * HW * 4)              # X / rolled / masked temps
    vmem_limit = int(min(64 << 20, max(32 << 20, 2 * est)))

    kernel = functools.partial(
        _coordconv_kernel, H=H, W=W, KH=KH, KW=KW, pad_h=pad_h, pad_w=pad_w,
        Cin=Cin, C_aug=C_aug, with_r=with_r, compute_dtype=compute_dtype)

    # TODO(synk): for large images (e.g. >=512x512 on v7x's 64 MiB VMEM), tile
    # H over an extra grid axis with a +/-pad_h row halo and build patches
    # directly in bf16 so the im2col block fits the scoped VMEM budget.
    out_flat = pl.pallas_call(
        kernel,
        out_shape=jax.ShapeDtypeStruct((B, Cout, HW), x.dtype),
        grid=grid,
        in_specs=[
            pl.BlockSpec((bt, C_pad, HW), lambda g: (g, 0, 0)),
            pl.BlockSpec((Cout, K_tot), lambda g: (0, 0)),
        ],
        out_specs=pl.BlockSpec((bt, Cout, HW), lambda g: (g, 0, 0)),
        compiler_params=pltpu.CompilerParams(
            dimension_semantics=("parallel",),
            vmem_limit_bytes=vmem_limit),
    )(x_pad, w2)

    return out_flat.reshape(B, Cout, H, W)            # free reshape


def _reference(x, weight, bias, with_r=False):
    """Pure-JAX reference matching the PyTorch module."""
    B, Cin, H, W = x.shape
    dt = x.dtype
    xx = (2.0 * jnp.arange(H, dtype=dt) / max(H - 1, 1) - 1.0)[None, None, :, None]
    yy = (2.0 * jnp.arange(W, dtype=dt) / max(W - 1, 1) - 1.0)[None, None, None, :]
    xx = jnp.broadcast_to(xx, (B, 1, H, W))
    yy = jnp.broadcast_to(yy, (B, 1, H, W))
    parts = [x, xx, yy]
    if with_r:
        parts.append(jnp.sqrt((xx - 0.5) ** 2 + (yy - 0.5) ** 2))
    x_aug = jnp.concatenate(parts, axis=1)
    out = lax.conv_general_dilated(
        x_aug, weight, window_strides=(1, 1), padding=((1, 1), (1, 1)),
        dimension_numbers=("NCHW", "OIHW", "NCHW"),
        precision=lax.Precision.HIGHEST)
    return out + bias[None, :, None, None]


if __name__ == "__main__":
    key = jax.random.PRNGKey(0)
    Cout, K = 8, 3
    configs = [
        # (B, Cin, H, W, with_r, use_bf16, atol, rtol)
        (2, 4, 16, 16, False, True,  2e-2, 2e-2),   # default bf16 path
        (2, 4, 16, 16, True,  True,  2e-2, 2e-2),   # with_r, bf16
        (4, 4, 16, 16, False, True,  2e-2, 2e-2),   # exercises Bt=2 batch packing
        (2, 4, 16, 16, False, False, 1e-4, 1e-4),   # f32 path, tight tolerance
    ]
    for (B, Cin, H, W, with_r, use_bf16, atol, rtol) in configs:
        C_aug = Cin + 2 + (1 if with_r else 0)
        kx, kwt, kb, key = jax.random.split(key, 4)
        x = jax.random.normal(kx, (B, Cin, H, W), dtype=jnp.float32)

        # Deterministic Conv2d-style init: U(-1/sqrt(fan_in), 1/sqrt(fan_in))
        fan_in = C_aug * K * K
        bound = 1.0 / (fan_in ** 0.5)
        weight = jax.random.uniform(kwt, (Cout, C_aug, K, K),
                                    minval=-bound, maxval=bound,
                                    dtype=jnp.float32)
        bias = jax.random.uniform(kb, (Cout,), minval=-bound, maxval=bound,
                                  dtype=jnp.float32)

        out = jax.block_until_ready(
            coord_conv(x, weight, bias, with_r=with_r, use_bf16=use_bf16))
        ref = jax.block_until_ready(_reference(x, weight, bias, with_r=with_r))
        assert out.shape == (B, Cout, H, W)
        assert jnp.allclose(out, ref, atol=atol, rtol=rtol), \
            f"mismatch vs reference (B={B}, with_r={with_r}, bf16={use_bf16})"

    print("KERNEL_OK")
</pallas_src>

<mosaic_0001>
module attributes {stable_mosaic.version = 11 : i64} {
  func.func @_coordconv_kernel(%arg0: i32, %arg1: memref<1x8x256xf32, #tpu.memory_space<vmem>>, %arg2: memref<8x72xbf16, #tpu.memory_space<vmem>>, %arg3: memref<1x8x256xf32, #tpu.memory_space<vmem>>) attributes {dimension_semantics = [#tpu.dimension_semantics<parallel>], iteration_bounds = array<i64: 2>, scalar_prefetch = 0 : i64, scratch_operands = 0 : i64, tpu.core_type = #tpu.core_type<tc>, window_params = [{transform_indices = @transform_0, window_bounds = array<i64: 1, 8, 256>}, {pipeline_mode = #tpu.pipeline_mode<synchronous>, transform_indices = @transform_1, window_bounds = array<i64: 8, 72>}, {transform_indices = @transform_2, window_bounds = array<i64: 1, 8, 256>}]} {
    %0 = tpu.iota {dimensions = array<i32: 1>} : vector<1x256xi32>
    %c4_i32 = arith.constant 4 : i32
    %1 = vector.broadcast %c4_i32 : i32 to vector<1x256xi32>
    %2 = arith.shrsi %0, %1 : vector<1x256xi32>
    %c15_i32 = arith.constant 15 : i32
    %3 = vector.broadcast %c15_i32 : i32 to vector<1x256xi32>
    %4 = arith.andi %0, %3 : vector<1x256xi32>
    %5 = arith.sitofp %2 : vector<1x256xi32> to vector<1x256xf32>
    %6 = arith.sitofp %4 : vector<1x256xi32> to vector<1x256xf32>
    %cst = arith.constant 2.000000e+00 : f32
    %7 = vector.broadcast %cst : f32 to vector<1x256xf32>
    %8 = arith.mulf %7, %5 : vector<1x256xf32>
    %cst_0 = arith.constant 0.0666666701 : f32
    %9 = vector.broadcast %cst_0 : f32 to vector<1x256xf32>
    %10 = arith.mulf %8, %9 : vector<1x256xf32>
    %cst_1 = arith.constant 1.000000e+00 : f32
    %11 = vector.broadcast %cst_1 : f32 to vector<1x256xf32>
    %12 = arith.subf %10, %11 : vector<1x256xf32>
    %cst_2 = arith.constant 2.000000e+00 : f32
    %13 = vector.broadcast %cst_2 : f32 to vector<1x256xf32>
    %14 = arith.mulf %13, %6 : vector<1x256xf32>
    %cst_3 = arith.constant 0.0666666701 : f32
    %15 = vector.broadcast %cst_3 : f32 to vector<1x256xf32>
    %16 = arith.mulf %14, %15 : vector<1x256xf32>
    %cst_4 = arith.constant 1.000000e+00 : f32
    %17 = vector.broadcast %cst_4 : f32 to vector<1x256xf32>
    %18 = arith.subf %16, %17 : vector<1x256xf32>
    %19 = tpu.iota {dimensions = array<i32: 0>} : vector<8x256xi32>
    %c4_i32_5 = arith.constant 4 : i32
    %20 = vector.broadcast %c4_i32_5 : i32 to vector<8x256xi32>
    %21 = arith.cmpi eq, %19, %20 : vector<8x256xi32>
    %cst_6 = arith.constant 0.000000e+00 : f32
    %22 = vector.shape_cast %12 : vector<1x256xf32> to vector<1x256xf32>
    %23 = vector.broadcast %22 : vector<1x256xf32> to vector<8x256xf32>
    %24 = vector.broadcast %cst_6 : f32 to vector<8x256xf32>
    %25 = arith.select %21, %23, %24 : vector<8x256xi1>, vector<8x256xf32>
    %c5_i32 = arith.constant 5 : i32
    %26 = vector.broadcast %c5_i32 : i32 to vector<8x256xi32>
    %27 = arith.cmpi eq, %19, %26 : vector<8x256xi32>
    %28 = vector.shape_cast %18 : vector<1x256xf32> to vector<1x256xf32>
    %29 = vector.broadcast %28 : vector<1x256xf32> to vector<8x256xf32>
    %30 = arith.select %27, %29, %25 : vector<8x256xi1>, vector<8x256xf32>
    %c6_i32 = arith.constant 6 : i32
    %31 = vector.broadcast %c6_i32 : i32 to vector<8x256xi32>
    %32 = arith.cmpi eq, %19, %31 : vector<8x256xi32>
    %cst_7 = arith.constant 1.000000e+00 : f32
    %33 = vector.broadcast %cst_7 : f32 to vector<8x256xf32>
    %34 = arith.select %32, %33, %30 : vector<8x256xi1>, vector<8x256xf32>
    %c0 = arith.constant 0 : index
    %c0_8 = arith.constant 0 : index
    %c0_9 = arith.constant 0 : index
    %35 = vector.load %arg1[%c0, %c0_8, %c0_9] : memref<1x8x256xf32, #tpu.memory_space<vmem>>, vector<1x8x256xf32>
    %36 = vector.shape_cast %35 : vector<1x8x256xf32> to vector<8x256xf32>
    %37 = arith.addf %36, %34 : vector<8x256xf32>
    %c1_i32 = arith.constant 1 : i32
    %38 = vector.broadcast %c1_i32 : i32 to vector<1x256xi32>
    %39 = arith.cmpi sge, %2, %38 : vector<1x256xi32>
    %c14_i32 = arith.constant 14 : i32
    %40 = vector.broadcast %c14_i32 : i32 to vector<1x256xi32>
    %41 = arith.cmpi sle, %2, %40 : vector<1x256xi32>
    %c1_i32_10 = arith.constant 1 : i32
    %42 = vector.broadcast %c1_i32_10 : i32 to vector<1x256xi32>
    %43 = arith.cmpi sge, %4, %42 : vector<1x256xi32>
    %c14_i32_11 = arith.constant 14 : i32
    %44 = vector.broadcast %c14_i32_11 : i32 to vector<1x256xi32>
    %45 = arith.cmpi sle, %4, %44 : vector<1x256xi32>
    %46 = arith.andi %39, %43 : vector<1x256xi1>
    %c17_i32 = arith.constant 17 : i32
    %47 = tpu.dynamic_rotate %37 by %c17_i32 dim 1 : vector<8x256xf32>, i32 -> vector<8x256xf32>
    %cst_12 = arith.constant 0.000000e+00 : f32
    %48 = vector.shape_cast %46 : vector<1x256xi1> to vector<1x256xi1>
    %49 = vector.broadcast %48 : vector<1x256xi1> to vector<8x256xi1>
    %50 = vector.broadcast %cst_12 : f32 to vector<8x256xf32>
    %51 = arith.select %49, %47, %50 : vector<8x256xi1>, vector<8x256xf32>
    %c16_i32 = arith.constant 16 : i32
    %52 = tpu.dynamic_rotate %37 by %c16_i32 dim 1 : vector<8x256xf32>, i32 -> vector<8x256xf32>
    %cst_13 = arith.constant 0.000000e+00 : f32
    %53 = vector.shape_cast %39 : vector<1x256xi1> to vector<1x256xi1>
    %54 = vector.broadcast %53 : vector<1x256xi1> to vector<8x256xi1>
    %55 = vector.broadcast %cst_13 : f32 to vector<8x256xf32>
    %56 = arith.select %54, %52, %55 : vector<8x256xi1>, vector<8x256xf32>
    %57 = arith.andi %39, %45 : vector<1x256xi1>
    %c15_i32_14 = arith.constant 15 : i32
    %58 = tpu.dynamic_rotate %37 by %c15_i32_14 dim 1 : vector<8x256xf32>, i32 -> vector<8x256xf32>
    %cst_15 = arith.constant 0.000000e+00 : f32
    %59 = vector.shape_cast %57 : vector<1x256xi1> to vector<1x256xi1>
    %60 = vector.broadcast %59 : vector<1x256xi1> to vector<8x256xi1>
    %61 = vector.broadcast %cst_15 : f32 to vector<8x256xf32>
    %62 = arith.select %60, %58, %61 : vector<8x256xi1>, vector<8x256xf32>
    %c1_i32_16 = arith.constant 1 : i32
    %63 = tpu.dynamic_rotate %37 by %c1_i32_16 dim 1 : vector<8x256xf32>, i32 -> vector<8x256xf32>
    %cst_17 = arith.constant 0.000000e+00 : f32
    %64 = vector.shape_cast %43 : vector<1x256xi1> to vector<1x256xi1>
    %65 = vector.broadcast %64 : vector<1x256xi1> to vector<8x256xi1>
    %66 = vector.broadcast %cst_17 : f32 to vector<8x256xf32>
    %67 = arith.select %65, %63, %66 : vector<8x256xi1>, vector<8x256xf32>
    %c255_i32 = arith.constant 255 : i32
    %68 = tpu.dynamic_rotate %37 by %c255_i32 dim 1 : vector<8x256xf32>, i32 -> vector<8x256xf32>
    %cst_18 = arith.constant 0.000000e+00 : f32
    %69 = vector.shape_cast %45 : vector<1x256xi1> to vector<1x256xi1>
    %70 = vector.broadcast %69 : vector<1x256xi1> to vector<8x256xi1>
    %71 = vector.broadcast %cst_18 : f32 to vector<8x256xf32>
    %72 = arith.select %70, %68, %71 : vector<8x256xi1>, vector<8x256xf32>
    %73 = arith.andi %41, %43 : vector<1x256xi1>
    %c241_i32 = arith.constant 241 : i32
    %74 = tpu.dynamic_rotate %37 by %c241_i32 dim 1 : vector<8x256xf32>, i32 -> vector<8x256xf32>
    %cst_19 = arith.constant 0.000000e+00 : f32
    %75 = vector.shape_cast %73 : vector<1x256xi1> to vector<1x256xi1>
    %76 = vector.broadcast %75 : vector<1x256xi1> to vector<8x256xi1>
    %77 = vector.broadcast %cst_19 : f32 to vector<8x256xf32>
    %78 = arith.select %76, %74, %77 : vector<8x256xi1>, vector<8x256xf32>
    %c240_i32 = arith.constant 240 : i32
    %79 = tpu.dynamic_rotate %37 by %c240_i32 dim 1 : vector<8x256xf32>, i32 -> vector<8x256xf32>
    %cst_20 = arith.constant 0.000000e+00 : f32
    %80 = vector.shape_cast %41 : vector<1x256xi1> to vector<1x256xi1>
    %81 = vector.broadcast %80 : vector<1x256xi1> to vector<8x256xi1>
    %82 = vector.broadcast %cst_20 : f32 to vector<8x256xf32>
    %83 = arith.select %81, %79, %82 : vector<8x256xi1>, vector<8x256xf32>
    %84 = arith.andi %41, %45 : vector<1x256xi1>
    %c239_i32 = arith.constant 239 : i32
    %85 = tpu.dynamic_rotate %37 by %c239_i32 dim 1 : vector<8x256xf32>, i32 -> vector<8x256xf32>
    %cst_21 = arith.constant 0.000000e+00 : f32
    %86 = vector.shape_cast %84 : vector<1x256xi1> to vector<1x256xi1>
    %87 = vector.broadcast %86 : vector<1x256xi1> to vector<8x256xi1>
    %88 = vector.broadcast %cst_21 : f32 to vector<8x256xf32>
    %89 = arith.select %87, %85, %88 : vector<8x256xi1>, vector<8x256xf32>
    %90 = tpu.concatenate %51, %56, %62, %67, %37, %72, %78, %83, %89 in 0 : vector<8x256xf32>, vector<8x256xf32>, vector<8x256xf32>, vector<8x256xf32>, vector<8x256xf32>, vector<8x256xf32>, vector<8x256xf32>, vector<8x256xf32>, vector<8x256xf32> -> vector<72x256xf32>
    %91 = arith.truncf %90 : vector<72x256xf32> to vector<72x256xbf16>
    %c0_22 = arith.constant 0 : index
    %c0_23 = arith.constant 0 : index
    %92 = vector.load %arg2[%c0_22, %c0_23] : memref<8x72xbf16, #tpu.memory_space<vmem>>, vector<8x72xbf16>
    %cst_24 = arith.constant dense<0.000000e+00> : vector<8x256xf32>
    %93 = tpu.matmul %92, %91, %cst_24 {dimension_numbers = #tpu.dot_dimension_numbers<[1], [0], [0], [1], [0, 0, 1, 1], [], []>} : vector<8x72xbf16>, vector<72x256xbf16>, vector<8x256xf32> -> vector<8x256xf32>
    %c0_25 = arith.constant 0 : index
    %c0_26 = arith.constant 0 : index
    %c0_27 = arith.constant 0 : index
    %94 = vector.load %arg3[%c0_25, %c0_26, %c0_27] : memref<1x8x256xf32, #tpu.memory_space<vmem>>, vector<1x8x256xf32>
    %95 = vector.shape_cast %94 : vector<1x8x256xf32> to vector<8x256xf32>
    %96 = vector.shape_cast %93 : vector<8x256xf32> to vector<1x8x256xf32>
    tpu.vector_store %arg3[%c0_25, %c0_26, %c0_27], %96 {strides = array<i32>} : memref<1x8x256xf32, #tpu.memory_space<vmem>>, vector<1x8x256xf32>,
    return
  }
  func.func @transform_0(%arg0: i32) -> (i32, i32, i32) {
    %c0_i32 = arith.constant 0 : i32
    %c0_i32_0 = arith.constant 0 : i32
    %c0_i32_1 = arith.constant 0 : i32
    return %arg0, %c0_i32, %c0_i32_0 : i32, i32, i32
  }
  func.func @transform_1(%arg0: i32) -> (i32, i32) {
    %c0_i32 = arith.constant 0 : i32
    %c0_i32_0 = arith.constant 0 : i32
    %c0_i32_1 = arith.constant 0 : i32
    return %c0_i32, %c0_i32_0 : i32, i32
  }
  func.func @transform_2(%arg0: i32) -> (i32, i32, i32) {
    %c0_i32 = arith.constant 0 : i32
    %c0_i32_0 = arith.constant 0 : i32
    %c0_i32_1 = arith.constant 0 : i32
    return %arg0, %c0_i32, %c0_i32_0 : i32, i32, i32
  }
}

</mosaic_0001>

<bundles_post_ra>
// kernel: tpu_custom_call.1
= control target key start
LH: loop header
LB: loop body
LE: loop exit
PB: predicated region body
PF: predicated region fallthrough
CT: control target
= control target key end

     0   :  { %7 = vsyncpa [#allocation3], 0  ;;  %s1075_s0 = inlined_call_operand.hbm [shape: f32[2,8,256], index: 0, kind: input, shape index: {}]   ;;  %s1076_s1 = inlined_call_operand.hbm [shape: bf16[8,72], index: 1, kind: input, shape index: {}]   ;;  %s1077_s2 = inlined_call_operand.hbm [shape: f32[2,8,256], index: 2, kind: output, shape index: {}]  }
   0x1   :  { %9 = vsyncpa [#allocation3 + $0x1], 0 }
   0x2   :  { %10 = vsyncpa [#allocation6], 0 }
   0x3   :  { %11 = vsyncpa [#allocation4], 0 }
   0x4   :  { %13 = vsyncpa [#allocation4 + $0x1], 0  ;;  %s794_s9 = smov 0   ;;  %s796_s10 = smov 0  }
   0x5   :  { %s798_s11 = smov 0   ;;  %s800_s12 = smov 0  }
   0x6 LB: > { %s815_s13 = sadd.s32 4294967295, %s767_s12   ;;  %s483_s14 = sadd.s32 4294967294, %s767_s12   ;;  %s767_s12 = sphi %s800_s12, %s1097_s12   ;;  %s763_s11 = sphi %s798_s11, %s1096_s11   ;;  %s759_s10 = sphi %s796_s10, %s1095_s10   ;;  %s755_s9 = sphi %s794_s9, %s1094_s9  }
   0x7   : > { %p39_p0 = scmp.ne.s32.totalorder %s759_s10, %s755_s9  ;;  %p40_p1 = scmp.eq.s32.totalorder %s815_s13, 0 }
   0x8   : > { %p84_p2 = scmp.eq.s32.totalorder %s815_s13, 1  ;;  %p90_p3 = scmp.eq.s32.totalorder %s483_s14, 1 }
   0x9   : > { %p824_p4 = por %p40_p1, %p39_p0  ;;  %p484_p5 = scmp.ge.s32.totalorder %s767_s12, 1 }
   0xa   : > { %p829_p6 = por %p90_p3, %p39_p0  ;;  %p97_p7 = scmp.lt.s32.totalorder %s767_s12, 3 }
   0xb   : > { %s109_s19 = sshll.u32 %s1076_s1, 4  ;;  %s769_s21 = smov [#allocation5]   ;;  %s110_s19 = int_to_ptr.hbm [resolvable:$true] %s109_s19 }
   0xc   : > { %p837_p8 = pnand %p484_p5, %p97_p7  ;;  %s111_s22 = sshll.u32 %s769_s21, 4  ;;  %s112_s22 = int_to_ptr.vmem [resolvable:$true] %s111_s22 }
   0xd   : > { %s847_s23 = sadd.s32 1, %s767_s12   ;;  %s26_s24 = sadd.s32 1, %s763_s11 }
   0xe   : > { %p539_p10 = pneg %p837_p8  ;;  %s23_s25 = ssub.s32 %s767_s12, %s847_s23 }
   0xf   : > { %p24_p12 = scmp.eq.s32.totalorder %s23_s25, 0  ;;  %p33_p13 = scmp.ne.s32.totalorder %s763_s11, %s759_s10 }
  0x10   : > { %p540_p11 = pnand %p539_p10, %p40_p1  ;;  %p34_p0 = scmp.eq.s32.totalorder %s767_s12, 0 }
  0x11   : > { %s856_s26 = scalar_select %p24_p12, %s763_s11, %s26_s24  }
  0x12   : > { %542 = dma.hbm_to_vmem [thread:$0]  (!%p540_p11), %s110_s19, 64, %s112_s22, [#allocation6]  }
  0x13   : > { %p860_p3 = por %p84_p2, %p33_p13  ;;  %p552_p5 = scmp.lt.s32.totalorder %s767_s12, 2 }
  0x14   : > { %s122_s28 = sand.u32 1, %s763_s11   ;;  %s529_s29 = sshll.u32 %s767_s12, 4 }
  0x15   : > { %p35_p7 = por %p34_p0, %p33_p13  ;;  %s487_s30 = sshll.u32 %s122_s28, 4 }
  0x16   : > { %s131_s5 = scalar_lea.hbm %s1075_s0, %s529_s29  ;;  %s126_s7 = scalar_lea.vmem [#allocation2], %s487_s30 }
  0x17   : > { %s133_s6 = sshll.u32 %s131_s5, 4  ;;  %s135_s8 = sshll.u32 %s126_s7, 4  ;;  %s134_s6 = int_to_ptr.hbm [resolvable:$true] %s133_s6  ;;  %s136_s8 = int_to_ptr.vmem [resolvable:$true] %s135_s8 }
  0x18   : > { %p870_p10 = pnand %p552_p5, %p35_p7  ;;  %s123_s17 = scalar_lea.sflag [#allocation3], %s122_s28 }
  0x19   : > { %s667_s18 = sshra.s32 %s134_s6, 4  ;;  %s674_s24 = scalar_lea.hbm %s1075_s0, 32  ;;  %s668_s18 = int_to_ptr.hbm [resolvable:$true] %s667_s18 }
  0x1a   : > { %s669_s19 = scalar_lea.hbm %s668_s18, 16  ;;  %p671_p11 = pneg %p870_p10 }
  0x1b   : > { %p670_p2 = scmp.ne.s32.totalorder %s668_s18, %s669_s19  ;;  %p675_p0 = scmp.lt.s32.totalorder %s668_s18, %s1075_s0 }
  0x1c   : > { %p676_p5 = scmp.lt.s32.totalorder %s674_s24, %s669_s19 }
  0x1d   : > { %p672_p12 = pnand %p671_p11, %p670_p2 }
  0x1e   : > { %p677_p7 = por %p676_p5, %p675_p0 }
  0x1f   : > { %p673_p13 = pneg %p672_p12 }
  0x21   : > { %p678_p9 = pnand %p677_p7, %p673_p13 }
  0x23   : > { %681 = shalt.err (!%p678_p9)
}
  0x24   : > { %546 = dma.hbm_to_vmem [thread:$0]  (!%p870_p10), %s134_s6, 256, %s136_s8, %s123_s17  }
  0x25   : > { %144 = sbr.rel (%p837_p8) target bundleno = 345 (0x159), region = 28  ;;  %s887_s28 = sand.u32 (!%p837_p8), 1, %s759_s10  }
  0x26   : > { %s491_s30 = sshll.u32 (!%p837_p8), %s887_s28, 4  ;;  %s147_s3 = scalar_lea.sflag (!%p837_p8), [#allocation3], %s887_s28 }
  0x27   : > { %s893_s4 = scalar_lea.vmem (!%p837_p8), [#allocation2], %s491_s30 }
  0x2a   : > { %742 = dma.done.wait (%p824_p4), %s147_s3, 256  }
  0x2b   : > { %744 = vsyncadd (%p824_p4), %s147_s3, 4294967040 }
  0x2c   : > { %746 = dma.done.wait (%p40_p1), [#allocation6], 64  }
  0x2d   : > { %748 = vsyncadd (%p40_p1), [#allocation6], 4294967232  ;;  %v178_v0 = vlaneseq  ;;  %v212_v25 = vld [vmem:[%s893_s4] sm:$0xff]  ;;  %v213_v29 = vld [vmem:[%s893_s4 + $0x8] sm:$0xff]  ;;  %s770_s15 = smov 111   ;;  %s771_s20 = smov 112  }
  0x2e   : > { %s772_s5 = smov 15   ;;  %s773_s6 = smov 113   ;;  %vm351_vm10 = vcmask 1043456  }
  0x2f   : > { %v903_v1 = vand.u32 127, %v178_v0  ;;  %v202_v9 = vshrl.u32 %v178_v0, 7  ;;  %s774_s7 = smov 127   ;;  %s775_s8 = smov 1  }
  0x30   : > { %s776_s14 = smov 16   ;;  %s777_s17 = smov 17  }
  0x31   : > { %v180_v2 = vadd.s32 128, %v903_v1  ;;  %v907_v3 = vshra.s32 %v903_v1, 4  ;;  %v910_v4 = vand.u32 15, %v903_v1  ;;  %vm203_vm0 = vcmp.eq.s32.totalorder %v202_v9, 4  ;;  %s530_s18 = sshll.u32 %s815_s13, 4  ;;  %s176_s24 = scalar_lea.vmem [#allocation7], %s491_s30 }
  0x32   : > { %vm206_vm1 = vcmp.eq.s32.totalorder %v202_v9, 5  ;;  %vm209_vm2 = vcmp.eq.s32.totalorder %v202_v9, 6  ;;  %vm327_vm8 = vcmp.lt.s32.totalorder %v903_v1, 111  ;;  %vm312_vm13 = vcmp.lt.s32.totalorder %v903_v1, 112  ;;  %s398_s22 = scalar_lea.hbm %s1077_s2, %s530_s18  ;;  %s400_s25 = sshll.u32 %s176_s24, 4  ;;  %s401_s25 = int_to_ptr.vmem [resolvable:$true] %s400_s25 }
  0x33   : > { %v912_v5 = vshra.s32 %v180_v2, 4  ;;  %v914_v6 = vand.u32 15, %v180_v2  ;;  %v185_v7 = vcvt.s32.f32 %v907_v3  ;;  %v187_v8 = vcvt.s32.f32 %v910_v4  ;;  %s402_s29 = sshll.u32 %s398_s22, 4  ;;  %s387_s3 = scalar_lea.sflag [#allocation4], %s887_s28  ;;  %s403_s29 = int_to_ptr.hbm [resolvable:$true] %s402_s29 }
  0x34   : > { %vm218_vm3 = vcmp.le.s32.totalorder %v907_v3, 14  ;;  %vm222_vm4 = vcmp.le.s32.totalorder %v910_v4, 14  ;;  %vm220_vm11 = vcmp.ge.s32.totalorder %v910_v4, 1  ;;  %vm299_vm15 = vcmp.lt.s32.totalorder %v903_v1, 113  ;;  %s711_s4 = sshra.s32 %s403_s29, 4  ;;  %s717_s30 = scalar_lea.hbm %s1077_s2, 32  ;;  %s712_s4 = int_to_ptr.hbm [resolvable:$true] %s711_s4 }
  0x35   : > { %v186_v10 = vcvt.s32.f32 %v912_v5  ;;  %v188_v11 = vcvt.s32.f32 %v914_v6  ;;  %v189_v12 = vmul.f32 2.0, %v185_v7  ;;  %v195_v13 = vmul.f32 2.0, %v187_v8  ;;  %vm321_vm7 = vmand %vm218_vm3, %vm222_vm4  ;;  %p718_p9 = scmp.lt.s32.totalorder %s712_s4, %s1077_s2 }
  0x36   : > { %vm219_vm5 = vcmp.le.s32.totalorder %v912_v5, 14  ;;  %vm223_vm6 = vcmp.le.s32.totalorder %v914_v6, 14  ;;  %vm221_vm12 = vcmp.ge.s32.totalorder %v914_v6, 1  ;;  %vm951_vm14 = vmand %vm218_vm3, %vm220_vm11 }
  0x37   : > { %v190_v14 = vmul.f32 2.0, %v186_v10  ;;  %v191_v15 = vmul.f32 0.06666667, %v189_v12  ;;  %v196_v16 = vmul.f32 2.0, %v188_v11  ;;  %v197_v17 = vmul.f32 0.06666667, %v195_v13  ;;  %vm322_vm9 = vmand %vm219_vm5, %vm223_vm6 }
  0x39   : > { %v192_v18 = vmul.f32 0.06666667, %v190_v14  ;;  %v494_v19 = vadd.f32 -1.0, %v191_v15  ;;  %v198_v20 = vmul.f32 0.06666667, %v196_v16  ;;  %v496_v21 = vadd.f32 -1.0, %v197_v17 }
  0x3b   : > { %v495_v22 = vadd.f32 -1.0, %v192_v18  ;;  %v497_v23 = vadd.f32 -1.0, %v198_v20  ;;  %v204_v24 = vsel %vm203_vm0, %v494_v19, 0.0 }
  0x3c   : > { %v207_v26 = vsel %vm206_vm1, %v496_v21, %v204_v24 }
  0x3d   : > { %v205_v27 = vsel %vm203_vm0, %v495_v22, 0.0  ;;  %v210_v28 = vsel %vm209_vm2, 1.0, %v207_v26  ;;  %vm294_vm0 = vmand %vm219_vm5, %vm221_vm12 }
  0x3e   : > { %v208_v30 = vsel %vm206_vm1, %v497_v23, %v205_v27  ;;  %v922_v31 = vadd.f32 %v212_v25, %v210_v28  ;;  %vm284_vm1 = vcmp.lt.s32.totalorder %v903_v1, 127 }
  0x3f   : > { %v211_v32 = vsel %vm209_vm2, 1.0, %v208_v30  ;;  %vm258_vm2 = vcmp.lt.s32.totalorder %v903_v1, 15 }
  0x40   : > { %v924_v33 = vadd.f32 %v213_v29, %v211_v32 }
  0x42   : > { %v597_v34 = vpack.i.bf16 %v924_v33, %v922_v31 }
  0x44   : > { %598 = vrot.lane.b32.xlu0 %v597_v34, %s770_s15  ;;  %608 = vrot.lane.b32.xlu1 %v597_v34, %s771_s20  ;;  %s713_s15 = scalar_lea.hbm %s712_s4, 16 }
  0x45   : > { %618 = vrot.lane.b32.xlu2 %v597_v34, %s772_s5  ;;  %p714_p1 = scmp.ne.s32.totalorder %s712_s4, %s713_s15  ;;  %p719_p10 = scmp.lt.s32.totalorder %s717_s30, %s713_s15 }
  0x47   : > { %p715_p4 = pnand %p714_p1, %p860_p3  ;;  %p720_p2 = por %p719_p10, %p718_p9 }
  0x49   : > { %p716_p8 = pneg %p715_p4 }
  0x4b   : > { %p721_p11 = pnand %p720_p2, %p716_p8 }
  0x4c   : > { %603 = vrot.lane.b32.xlu0 %v597_v34, %s773_s6  ;;  %613 = vrot.lane.b32.xlu1 %v597_v34, %s774_s7 }
  0x4d   : > { %623 = vrot.lane.b32.xlu2 %v597_v34, %s775_s8 }
  0x54   : > { %633 = vrot.lane.b32.xlu1 %v597_v34, %s776_s14  ;;  %628 = vrot.lane.b32.xlu0 %v597_v34, %s777_s17 }
  0x9f   : > { %v928_v35 = vpop.permute.xlu2 %618 }
  0xa0   : > { %v621_v48 = vunpack.i.h.bf16 %v928_v35  ;;  %v620_v53 = vunpack.i.l.bf16 %v928_v35 }
  0xa2   : > { %v260_v16 = vsel %vm258_vm2, %v621_v48, %v620_v53  ;;  %v259_v18 = vsel %vm258_vm2, %v620_v53, %v621_v48 }
  0xa7   : > { %v624_v49 = vpop.permute.xlu2 %623 }
  0xa8   : > { %v626_v60 = vunpack.i.h.bf16 %v624_v49  ;;  %v625_v9 = vunpack.i.l.bf16 %v624_v49 }
  0xb6   : > { %v599_v36 = vpop.permute.xlu0 %598  ;;  %v609_v37 = vpop.permute.xlu1 %608 }
  0xb7   : > { %v601_v38 = vunpack.i.h.bf16 %v599_v36  ;;  %v600_v39 = vunpack.i.l.bf16 %v599_v36  ;;  %v611_v46 = vunpack.i.h.bf16 %v609_v37  ;;  %v610_v47 = vunpack.i.l.bf16 %v609_v37 }
  0xb9   : > { %v328_v40 = vsel %vm327_vm8, %v600_v39, %v601_v38  ;;  %v329_v41 = vsel %vm327_vm8, %v601_v38, %v600_v39  ;;  %v313_v61 = vsel %vm312_vm13, %v610_v47, %v611_v46  ;;  %v314_v63 = vsel %vm312_vm13, %v611_v46, %v610_v47 }
  0xba   : > { %v334_v42 = vsel %vm321_vm7, %v328_v40, 0.0  ;;  %v335_v43 = vsel %vm322_vm9, %v329_v41, 0.0  ;;  %vm969_vm7 = vmpackc.low %vm218_vm3, %vm951_vm14  ;;  %vm216_vm8 = vcmp.ge.s32.totalorder %v907_v3, 1  ;;  %vm778_vm3 = vmmov 1  }
  0xbb   : > { %v344_v44 = vpack.c.bf16 %v334_v42, %v334_v42  ;;  %v345_v45 = vpack.c.bf16 %v335_v43, %v335_v43  ;;  %vm511_vm9 = vmpackc.low %vm219_vm5, %vm294_vm0  ;;  %vm217_vm13 = vcmp.ge.s32.totalorder %v912_v5, 1  ;;  %vm271_vm5 = vcmp.lt.s32.totalorder %v903_v1, 1 }
  0xbc   : > { %vm991_vm14 = vmpackc.low %vm223_vm6, %vm778_vm3  ;;  %v273_v21 = vsel %vm271_vm5, %v626_v60, %v625_v9  ;;  %v272_v22 = vsel %vm271_vm5, %v625_v9, %v626_v60 }
  0xbd   : > { %v353_v50 = vsel %vm351_vm10, %v344_v44, 0  ;;  %v356_v51 = vsel %vm351_vm10, %v345_v45, 0  ;;  %vm984_vm10 = vmpackc.low %vm222_vm4, %vm778_vm3  ;;  %v505_v30 = vpack.c.bf16 %v273_v21, %v260_v16 }
  0xbe   : > { %v604_v54 = vpop.permute.xlu0 %603  ;;  %361 = vmatpush.bf16.msra.mxu0 %v353_v50  ;;  %374 = vmatpush.bf16.msra.mxu1 %v356_v51  ;;  %v614_v55 = vpop.permute.xlu1 %613  ;;  %vm1010_vm0 = vmand %vm217_vm13, %vm223_vm6 }
  0xbf   : > { %v606_v56 = vunpack.i.h.bf16 %v604_v54  ;;  %v605_v57 = vunpack.i.l.bf16 %v604_v54  ;;  %v616_v58 = vunpack.i.h.bf16 %v614_v55  ;;  %v615_v59 = vunpack.i.l.bf16 %v614_v55  ;;  %vm517_vm2 = vmpackc.low %vm221_vm12, %vm1010_vm0 }
  0xc1   : > { %v300_v0 = vsel %vm299_vm15, %v605_v57, %v606_v56  ;;  %v301_v2 = vsel %vm299_vm15, %v606_v56, %v605_v57  ;;  %v285_v7 = vsel %vm284_vm1, %v615_v59, %v616_v58  ;;  %v286_v8 = vsel %vm284_vm1, %v616_v58, %v615_v59  ;;  %vm252_vm15 = vmand %vm216_vm8, %vm222_vm4 }
  0xc2   : > { %v499_v10 = vpack.c.bf16 %v313_v61, %v300_v0  ;;  %v512_v11 = vpack.c.bf16 %v314_v63, %v301_v2  ;;  %v502_v14 = vpack.c.bf16 %v285_v7, %v922_v31  ;;  %v515_v15 = vpack.c.bf16 %v286_v8, %v924_v33  ;;  %vm504_vm6 = vmpackc.low %vm220_vm11, %vm252_vm15  ;;  %v346_v33 = vld [vmem:[#allocation5] sm:$0xf] }
  0xc3   : > { %vm230_vm4 = vcmp.lt.s32.totalorder %v903_v1, 17  ;;  %vm243_vm1 = vcmp.lt.s32.totalorder %v903_v1, 16  ;;  %v518_v31 = vpack.c.bf16 %v272_v22, %v259_v18 }
  0xc4   : > { %500 = vmatpush.bf16.msk.msra.mxu0 %vm969_vm7, %v499_v10  ;;  %513 = vmatpush.bf16.msk.msra.mxu1 %vm511_vm9, %v512_v11  ;;  %vm224_vm7 = vmand %vm216_vm8, %vm220_vm11 }
  0xc5   : > { %vm225_vm9 = vmand %vm217_vm13, %vm221_vm12 }
  0xc6   : > { %v634_v19 = vpop.permute.xlu1 %633  ;;  %v629_v20 = vpop.permute.xlu0 %628  ;;  %vm507_vm3 = vmpackc.low %vm216_vm8, %vm224_vm7 }
  0xc7   : > { %v636_v23 = vunpack.i.h.bf16 %v634_v19  ;;  %v635_v24 = vunpack.i.l.bf16 %v634_v19  ;;  %v631_v25 = vunpack.i.h.bf16 %v629_v20  ;;  %v630_v26 = vunpack.i.l.bf16 %v629_v20  ;;  %vm520_vm11 = vmpackc.low %vm217_vm13, %vm225_vm9 }
  0xc8   : > { %503 = vmatpush.bf16.msk.msra.mxu0 %vm984_vm10, %v502_v14  ;;  %516 = vmatpush.bf16.msk.msra.mxu1 %vm991_vm14, %v515_v15  ;;  %vm347_vm10 = vcmask 588800  }
  0xc9   : > { %v232_v1 = vsel %vm230_vm4, %v631_v25, %v630_v26  ;;  %v245_v27 = vsel %vm243_vm1, %v636_v23, %v635_v24  ;;  %v231_v28 = vsel %vm230_vm4, %v630_v26, %v631_v25  ;;  %v244_v29 = vsel %vm243_vm1, %v635_v24, %v636_v23 }
  0xca   : > { %v508_v4 = vpack.c.bf16 %v245_v27, %v232_v1  ;;  %v521_v32 = vpack.c.bf16 %v244_v29, %v231_v28 }
  0xcc   : > { %506 = vmatpush.bf16.msk.msra.mxu0 %vm504_vm6, %v505_v30  ;;  %519 = vmatpush.bf16.msk.msra.mxu1 %vm517_vm2, %v518_v31 }
  0xd0   : > { %509 = vmatpush.bf16.msk.msra.mxu0 %vm507_vm3, %v508_v4  ;;  %522 = vmatpush.bf16.msk.msra.mxu1 %vm520_vm11, %v521_v32 }
  0xd3   : > { %510 = vmatmul.msk.bf16.vlgmr.msra.gmra.mxu0 %vm347_vm10, %v346_v33  ;;  %523 = vmatmul.msk.bf16.vlgmr.msra.gmra.mxu1 %vm347_vm10, %v346_v33 }
 0x150   : > { %v367_v3 = vpop.f32.mrf.mxu0  ;;  %v380_v5 = vpop.f32.mrf.mxu1 }
 0x151   : > { %384 = vst [vmem:[%s176_s24] sm:$0xff] %v367_v3 }
 0x152   : > { %385 = vst [vmem:[%s176_s24 + $0x8] sm:$0xff] %v380_v5 }
 0x153   : > { %724 = shalt.err (!%p721_p11)
}
 0x154   : > { %537 = dma.vmem_to_hbm [thread:$0]  (%p860_p3), %s401_s25, 256, %s403_s29, %s387_s3  }
 0x158   : > { %v369_v6 = vpop.f32.mrf.mxu0  ;;  %v382_v34 = vpop.f32.mrf.mxu1 }
 0x159 PF: > { %s414_s28 = sand.u32 1, %s755_s9   ;;  %p1093_p12 = scmp.ge.s32.totalorder %s767_s12, 2 }
 0x15a   : > { %s415_s7 = scalar_lea.sflag [#allocation4], %s414_s28 }
 0x15b   : > { %p548_p13 = pnand %p1093_p12, %p829_p6 }
 0x15d   : > { %p549_p0 = pneg %p548_p13 }
 0x15f   : > { %750 = dma.done.wait (%p549_p0), %s415_s7, 256  }
 0x160   : > { %752 = vsyncadd (%p549_p0), %s415_s7, 4294967040  ;;  %p16_p3 = scmp.ge.s32.totalorder %s847_s23, 4   ;;  %s1094_s9 = smov %s759_s10 }
 0x161   : > { %s1095_s10 = smov %s763_s11  ;;  %s1096_s11 = smov %s856_s26 }
 0x162   : > { %s1097_s12 = smov %s847_s23  ;;  %18 = sbr.rel (!%p16_p3) target bundleno = 6 (0x6), region = 77 }
 0x167   :  { %421 = vsyncpa [#allocation3], 1 }
 0x168   :  { %423 = vsyncpa [#allocation3 + $0x1], 1 }
 0x169   :  { %424 = vsyncpa [#allocation6], 1 }
 0x16a   :  { %425 = vsyncpa [#allocation4], 1 }
 0x16b   :  { %427 = vsyncpa [#allocation4 + $0x1], 1 }

</bundles_post_ra>
